<compile_context>
chip_gen: v6e
topology: v6e:2x2x1
jax: 0.10.0
libtpu: 0.0.40
codegen_flags: <defaults>
</compile_context>

<pallas_src>
import functools

import jax
import jax.numpy as jnp
from jax.experimental import pallas as pl
from jax.experimental.pallas import tpu as pltpu

LANE = 128


def _round_up(x, m):
    return ((x + m - 1) // m) * m


def _cdiv(a, b):
    return -(-a // b)


def _agent_kernel(xp_ref, xn_ref, wp1_ref, bp1_ref, wn1_ref, bn1_ref,
                  wn2_ref, bn2_ref, wh_ref, bh_ref, out_ref):
    # ---- policy hidden (pre-gate), f32 accumulation on the MXU ----
    p_pre = jnp.tanh(
        jnp.dot(xp_ref[...], wp1_ref[...], preferred_element_type=jnp.float32)
        + bp1_ref[...])

    # ---- neuromod hidden ----
    nm_h = jnp.tanh(
        jnp.dot(xn_ref[...], wn1_ref[...], preferred_element_type=jnp.float32)
        + bn1_ref[...])

    # ---- neuromod gate layer ----
    gate = jax.nn.sigmoid(
        jnp.dot(nm_h.astype(wn2_ref.dtype), wn2_ref[...],
                preferred_element_type=jnp.float32)
        + bn2_ref[...])

    # ---- neuromodulation + fused policy/value head (lane-dense bf16 out) ----
    p_h = (p_pre * gate).astype(wh_ref.dtype)
    out_ref[...] = (
        jnp.dot(p_h, wh_ref[...], preferred_element_type=jnp.float32)
        + bh_ref[...]
    ).astype(out_ref.dtype)


def pack_params(params):
    """One-time packing: bf16 weight casts + fused, 128-lane-padded head."""
    H, A = params["w_pi"].shape
    ao_pad = _round_up(A + 1, LANE)           # policy logits + value column

    wh = jnp.zeros((H, ao_pad), jnp.float32)
    wh = wh.at[:, :A].set(params["w_pi"])
    wh = wh.at[:, A:A + 1].set(params["w_v"])
    bh = jnp.zeros((1, ao_pad), jnp.float32)
    bh = bh.at[:, :A].set(params["b_pi"])
    bh = bh.at[:, A:A + 1].set(params["b_v"])

    return {
        "w_p1": params["w_p1"].astype(jnp.bfloat16),
        "b_p1": params["b_p1"].reshape(1, -1).astype(jnp.float32),
        "w_nm1": params["w_nm1"].astype(jnp.bfloat16),
        "b_nm1": params["b_nm1"].reshape(1, -1).astype(jnp.float32),
        "w_nm2": params["w_nm2"].astype(jnp.bfloat16),
        "b_nm2": params["b_nm2"].reshape(1, -1).astype(jnp.float32),
        "w_head": wh.astype(jnp.bfloat16),
        "b_head": bh,
    }


def _choose_batch_tiling(B, max_tile=512):
    b16 = _round_up(max(B, 1), 16)
    if b16 <= 16:
        return b16, b16
    # >= 2 parallel grid steps (keeps both v7x TensorCores busy), tiles
    # <= max_tile rows, padding kept to at most tile_b - 1 rows.
    n_tiles = max(2, _cdiv(b16, max_tile))
    tile_b = _round_up(_cdiv(b16, n_tiles), 16)
    return tile_b, tile_b * n_tiles


@functools.partial(jax.jit, static_argnames=("n_actions",))
def neuromodulated_agent_forward(policy_input, neuromod_input, packed, n_actions):
    """Fused agent forward. Returns (policy_output [B,A], value [B,1]) in f32."""
    B, d_pol = policy_input.shape
    _, d_nm = neuromod_input.shape
    H = packed["w_p1"].shape[1]
    ao_pad = packed["w_head"].shape[1]
    A = n_actions

    tile_b, b_pad = _choose_batch_tiling(B)

    # Batch-pad the two activation streams directly in bf16 (no f32 staging).
    xp = jnp.zeros((b_pad, d_pol), jnp.bfloat16).at[:B].set(
        policy_input.astype(jnp.bfloat16))
    xn = jnp.zeros((b_pad, d_nm), jnp.bfloat16).at[:B].set(
        neuromod_input.astype(jnp.bfloat16))

    grid = (b_pad // tile_b,)

    def resident(shape):
        # Resident weights/biases (constant index_map).
        # NOTE: tiny at these shapes; for H >= ~2048 add
        # pipeline_mode=pl.Buffered(1) so they are not double-buffered in VMEM.
        return pl.BlockSpec(shape, lambda i: (0, 0))

    flops = 2 * b_pad * H * (d_pol + d_nm + H + ao_pad)
    transcendentals = 3 * b_pad * H
    bytes_accessed = (
        (xp.size + xn.size) * 2
        + (packed["w_p1"].size + packed["w_nm1"].size
           + packed["w_nm2"].size + packed["w_head"].size) * 2
        + (packed["b_p1"].size + packed["b_nm1"].size
           + packed["b_nm2"].size + packed["b_head"].size) * 4
        + b_pad * ao_pad * 2
    )

    out = pl.pallas_call(
        _agent_kernel,
        out_shape=jax.ShapeDtypeStruct((b_pad, ao_pad), jnp.bfloat16),
        grid=grid,
        in_specs=[
            pl.BlockSpec((tile_b, d_pol), lambda i: (i, 0)),   # policy input
            pl.BlockSpec((tile_b, d_nm), lambda i: (i, 0)),    # neuromod input
            resident((d_pol, H)),    # w_p1
            resident((1, H)),        # b_p1
            resident((d_nm, H)),     # w_nm1
            resident((1, H)),        # b_nm1
            resident((H, H)),        # w_nm2
            resident((1, H)),        # b_nm2
            resident((H, ao_pad)),   # w_head (policy logits || value, lane-padded)
            resident((1, ao_pad)),   # b_head
        ],
        out_specs=pl.BlockSpec((tile_b, ao_pad), lambda i: (i, 0)),
        compiler_params=pltpu.CompilerParams(
            dimension_semantics=("parallel",),
            vmem_limit_bytes=32 * 1024 * 1024,
        ),
        cost_estimate=pl.CostEstimate(
            flops=flops,
            transcendentals=transcendentals,
            bytes_accessed=bytes_accessed,
        ),
    )(xp, xn,
      packed["w_p1"], packed["b_p1"],
      packed["w_nm1"], packed["b_nm1"],
      packed["w_nm2"], packed["b_nm2"],
      packed["w_head"], packed["b_head"])

    policy_output = out[:B, :A].astype(jnp.float32)
    value = out[:B, A:A + 1].astype(jnp.float32)
    return policy_output, value


def init_params(key, d_policy, d_neuromod, hidden, n_actions):
    ks = jax.random.split(key, 6)
    scale = 0.1
    return {
        # neuromod_net
        "w_nm1": scale * jax.random.normal(ks[0], (d_neuromod, hidden), jnp.float32),
        "b_nm1": jnp.zeros((1, hidden), jnp.float32),
        "w_nm2": scale * jax.random.normal(ks[1], (hidden, hidden), jnp.float32),
        "b_nm2": jnp.zeros((1, hidden), jnp.float32),
        # policy_net
        "w_p1": scale * jax.random.normal(ks[2], (d_policy, hidden), jnp.float32),
        "b_p1": jnp.zeros((1, hidden), jnp.float32),
        "w_pi": scale * jax.random.normal(ks[3], (hidden, n_actions), jnp.float32),
        "b_pi": jnp.zeros((1, n_actions), jnp.float32),
        "w_v": scale * jax.random.normal(ks[4], (hidden, 1), jnp.float32),
        "b_v": jnp.zeros((1, 1), jnp.float32),
    }


if __name__ == "__main__":
    # TODO(synk): recurrent (policy_has_hidden_state / neuromod_has_hidden_state)
    # branches of the wrapper are not instantiated here.
    B, D_POL, D_NM, H, A = 8, 32, 32, 32, 8

    key = jax.random.PRNGKey(0)
    k_pol, k_nm, k_param = jax.random.split(key, 3)

    policy_input = jax.random.normal(k_pol, (B, D_POL), jnp.float32)
    neuromod_input = jax.random.normal(k_nm, (B, D_NM), jnp.float32)
    params = init_params(k_param, D_POL, D_NM, H, A)

    # One-time weight packing (hoisted out of the per-call path).
    packed = jax.block_until_ready(pack_params(params))

    policy_output, value = neuromodulated_agent_forward(
        policy_input, neuromod_input, packed, A)
    jax.block_until_ready((policy_output, value))

    # Pure-JAX f32 reference (kernel uses bf16 MXU inputs/outputs -> relaxed tol).
    nm_h = jnp.tanh(neuromod_input @ params["w_nm1"] + params["b_nm1"])
    gate = jax.nn.sigmoid(nm_h @ params["w_nm2"] + params["b_nm2"])
    p_h = jnp.tanh(policy_input @ params["w_p1"] + params["b_p1"]) * gate
    ref_pol = p_h @ params["w_pi"] + params["b_pi"]
    ref_val = p_h @ params["w_v"] + params["b_v"]
    assert policy_output.shape == (B, A) and value.shape == (B, 1)
    assert jnp.allclose(policy_output, ref_pol, atol=3e-2, rtol=3e-2)
    assert jnp.allclose(value, ref_val, atol=3e-2, rtol=3e-2)

    print("KERNEL_OK")
</pallas_src>

<mosaic_0001>
module attributes {stable_mosaic.version = 11 : i64} {
  func.func @_agent_kernel(%arg0: i32, %arg1: memref<16x32xbf16, #tpu.memory_space<vmem>>, %arg2: memref<16x32xbf16, #tpu.memory_space<vmem>>, %arg3: memref<32x32xbf16, #tpu.memory_space<vmem>>, %arg4: memref<1x32xf32, #tpu.memory_space<vmem>>, %arg5: memref<32x32xbf16, #tpu.memory_space<vmem>>, %arg6: memref<1x32xf32, #tpu.memory_space<vmem>>, %arg7: memref<32x32xbf16, #tpu.memory_space<vmem>>, %arg8: memref<1x32xf32, #tpu.memory_space<vmem>>, %arg9: memref<32x128xbf16, #tpu.memory_space<vmem>>, %arg10: memref<1x128xf32, #tpu.memory_space<vmem>>, %arg11: memref<16x128xbf16, #tpu.memory_space<vmem>>) attributes {dimension_semantics = [#tpu.dimension_semantics<parallel>], iteration_bounds = array<i64: 1>, scalar_prefetch = 0 : i64, scratch_operands = 0 : i64, tpu.core_type = #tpu.core_type<tc>, window_params = [{transform_indices = @transform_0, window_bounds = array<i64: 16, 32>}, {transform_indices = @transform_1, window_bounds = array<i64: 16, 32>}, {pipeline_mode = #tpu.pipeline_mode<synchronous>, transform_indices = @transform_2, window_bounds = array<i64: 32, 32>}, {pipeline_mode = #tpu.pipeline_mode<synchronous>, transform_indices = @transform_3, window_bounds = array<i64: 1, 32>}, {pipeline_mode = #tpu.pipeline_mode<synchronous>, transform_indices = @transform_4, window_bounds = array<i64: 32, 32>}, {pipeline_mode = #tpu.pipeline_mode<synchronous>, transform_indices = @transform_5, window_bounds = array<i64: 1, 32>}, {pipeline_mode = #tpu.pipeline_mode<synchronous>, transform_indices = @transform_6, window_bounds = array<i64: 32, 32>}, {pipeline_mode = #tpu.pipeline_mode<synchronous>, transform_indices = @transform_7, window_bounds = array<i64: 1, 32>}, {pipeline_mode = #tpu.pipeline_mode<synchronous>, transform_indices = @transform_8, window_bounds = array<i64: 32, 128>}, {pipeline_mode = #tpu.pipeline_mode<synchronous>, transform_indices = @transform_9, window_bounds = array<i64: 1, 128>}, {transform_indices = @transform_10, window_bounds = array<i64: 16, 128>}]} {
    %c0 = arith.constant 0 : index
    %c0_0 = arith.constant 0 : index
    %0 = vector.load %arg1[%c0, %c0_0] : memref<16x32xbf16, #tpu.memory_space<vmem>>, vector<16x32xbf16>
    %c0_1 = arith.constant 0 : index
    %c0_2 = arith.constant 0 : index
    %1 = vector.load %arg3[%c0_1, %c0_2] : memref<32x32xbf16, #tpu.memory_space<vmem>>, vector<32x32xbf16>
    %cst = arith.constant dense<0.000000e+00> : vector<16x32xf32>
    %2 = tpu.matmul %0, %1, %cst {dimension_numbers = #tpu.dot_dimension_numbers<[1], [0], [0], [1], [0, 0, 1, 1], [], []>} : vector<16x32xbf16>, vector<32x32xbf16>, vector<16x32xf32> -> vector<16x32xf32>
    %c0_3 = arith.constant 0 : index
    %c0_4 = arith.constant 0 : index
    %3 = vector.load %arg4[%c0_3, %c0_4] : memref<1x32xf32, #tpu.memory_space<vmem>>, vector<1x32xf32>
    %4 = vector.broadcast %3 : vector<1x32xf32> to vector<16x32xf32>
    %5 = arith.addf %2, %4 : vector<16x32xf32>
    %6 = math.tanh %5 : vector<16x32xf32>
    %c0_5 = arith.constant 0 : index
    %c0_6 = arith.constant 0 : index
    %7 = vector.load %arg2[%c0_5, %c0_6] : memref<16x32xbf16, #tpu.memory_space<vmem>>, vector<16x32xbf16>
    %c0_7 = arith.constant 0 : index
    %c0_8 = arith.constant 0 : index
    %8 = vector.load %arg5[%c0_7, %c0_8] : memref<32x32xbf16, #tpu.memory_space<vmem>>, vector<32x32xbf16>
    %cst_9 = arith.constant dense<0.000000e+00> : vector<16x32xf32>
    %9 = tpu.matmul %7, %8, %cst_9 {dimension_numbers = #tpu.dot_dimension_numbers<[1], [0], [0], [1], [0, 0, 1, 1], [], []>} : vector<16x32xbf16>, vector<32x32xbf16>, vector<16x32xf32> -> vector<16x32xf32>
    %c0_10 = arith.constant 0 : index
    %c0_11 = arith.constant 0 : index
    %10 = vector.load %arg6[%c0_10, %c0_11] : memref<1x32xf32, #tpu.memory_space<vmem>>, vector<1x32xf32>
    %11 = vector.broadcast %10 : vector<1x32xf32> to vector<16x32xf32>
    %12 = arith.addf %9, %11 : vector<16x32xf32>
    %13 = math.tanh %12 : vector<16x32xf32>
    %14 = arith.truncf %13 : vector<16x32xf32> to vector<16x32xbf16>
    %c0_12 = arith.constant 0 : index
    %c0_13 = arith.constant 0 : index
    %15 = vector.load %arg7[%c0_12, %c0_13] : memref<32x32xbf16, #tpu.memory_space<vmem>>, vector<32x32xbf16>
    %cst_14 = arith.constant dense<0.000000e+00> : vector<16x32xf32>
    %16 = tpu.matmul %14, %15, %cst_14 {dimension_numbers = #tpu.dot_dimension_numbers<[1], [0], [0], [1], [0, 0, 1, 1], [], []>} : vector<16x32xbf16>, vector<32x32xbf16>, vector<16x32xf32> -> vector<16x32xf32>
    %c0_15 = arith.constant 0 : index
    %c0_16 = arith.constant 0 : index
    %17 = vector.load %arg8[%c0_15, %c0_16] : memref<1x32xf32, #tpu.memory_space<vmem>>, vector<1x32xf32>
    %18 = vector.broadcast %17 : vector<1x32xf32> to vector<16x32xf32>
    %19 = arith.addf %16, %18 : vector<16x32xf32>
    %20 = arith.negf %19 : vector<16x32xf32>
    %21 = math.exp %20 : vector<16x32xf32>
    %cst_17 = arith.constant 1.000000e+00 : f32
    %22 = vector.broadcast %cst_17 : f32 to vector<16x32xf32>
    %23 = arith.addf %22, %21 : vector<16x32xf32>
    %24 = arith.divf %22, %23 : vector<16x32xf32>
    %25 = arith.mulf %6, %24 : vector<16x32xf32>
    %26 = arith.truncf %25 : vector<16x32xf32> to vector<16x32xbf16>
    %c0_18 = arith.constant 0 : index
    %c0_19 = arith.constant 0 : index
    %27 = vector.load %arg9[%c0_18, %c0_19] : memref<32x128xbf16, #tpu.memory_space<vmem>>, vector<32x128xbf16>
    %cst_20 = arith.constant dense<0.000000e+00> : vector<16x128xf32>
    %28 = tpu.matmul %26, %27, %cst_20 {dimension_numbers = #tpu.dot_dimension_numbers<[1], [0], [0], [1], [0, 0, 1, 1], [], []>} : vector<16x32xbf16>, vector<32x128xbf16>, vector<16x128xf32> -> vector<16x128xf32>
    %c0_21 = arith.constant 0 : index
    %c0_22 = arith.constant 0 : index
    %29 = vector.load %arg10[%c0_21, %c0_22] : memref<1x128xf32, #tpu.memory_space<vmem>>, vector<1x128xf32>
    %30 = vector.broadcast %29 : vector<1x128xf32> to vector<16x128xf32>
    %31 = arith.addf %28, %30 : vector<16x128xf32>
    %32 = arith.truncf %31 : vector<16x128xf32> to vector<16x128xbf16>
    %c0_23 = arith.constant 0 : index
    %c0_24 = arith.constant 0 : index
    %33 = vector.load %arg11[%c0_23, %c0_24] : memref<16x128xbf16, #tpu.memory_space<vmem>>, vector<16x128xbf16>
    tpu.vector_store %arg11[%c0_23, %c0_24], %32 {strides = array<i32>} : memref<16x128xbf16, #tpu.memory_space<vmem>>, vector<16x128xbf16>,
    return
  }
  func.func @transform_0(%arg0: i32) -> (i32, i32) {
    %c0_i32 = arith.constant 0 : i32
    %c0_i32_0 = arith.constant 0 : i32
    return %arg0, %c0_i32 : i32, i32
  }
  func.func @transform_1(%arg0: i32) -> (i32, i32) {
    %c0_i32 = arith.constant 0 : i32
    %c0_i32_0 = arith.constant 0 : i32
    return %arg0, %c0_i32 : i32, i32
  }
  func.func @transform_2(%arg0: i32) -> (i32, i32) {
    %c0_i32 = arith.constant 0 : i32
    %c0_i32_0 = arith.constant 0 : i32
    %c0_i32_1 = arith.constant 0 : i32
    return %c0_i32, %c0_i32_0 : i32, i32
  }
  func.func @transform_3(%arg0: i32) -> (i32, i32) {
    %c0_i32 = arith.constant 0 : i32
    %c0_i32_0 = arith.constant 0 : i32
    %c0_i32_1 = arith.constant 0 : i32
    return %c0_i32, %c0_i32_0 : i32, i32
  }
  func.func @transform_4(%arg0: i32) -> (i32, i32) {
    %c0_i32 = arith.constant 0 : i32
    %c0_i32_0 = arith.constant 0 : i32
    %c0_i32_1 = arith.constant 0 : i32
    return %c0_i32, %c0_i32_0 : i32, i32
  }
  func.func @transform_5(%arg0: i32) -> (i32, i32) {
    %c0_i32 = arith.constant 0 : i32
    %c0_i32_0 = arith.constant 0 : i32
    %c0_i32_1 = arith.constant 0 : i32
    return %c0_i32, %c0_i32_0 : i32, i32
  }
  func.func @transform_6(%arg0: i32) -> (i32, i32) {
    %c0_i32 = arith.constant 0 : i32
    %c0_i32_0 = arith.constant 0 : i32
    %c0_i32_1 = arith.constant 0 : i32
    return %c0_i32, %c0_i32_0 : i32, i32
  }
  func.func @transform_7(%arg0: i32) -> (i32, i32) {
    %c0_i32 = arith.constant 0 : i32
    %c0_i32_0 = arith.constant 0 : i32
    %c0_i32_1 = arith.constant 0 : i32
    return %c0_i32, %c0_i32_0 : i32, i32
  }
  func.func @transform_8(%arg0: i32) -> (i32, i32) {
    %c0_i32 = arith.constant 0 : i32
    %c0_i32_0 = arith.constant 0 : i32
    %c0_i32_1 = arith.constant 0 : i32
    return %c0_i32, %c0_i32_0 : i32, i32
  }
  func.func @transform_9(%arg0: i32) -> (i32, i32) {
    %c0_i32 = arith.constant 0 : i32
    %c0_i32_0 = arith.constant 0 : i32
    %c0_i32_1 = arith.constant 0 : i32
    return %c0_i32, %c0_i32_0 : i32, i32
  }
  func.func @transform_10(%arg0: i32) -> (i32, i32) {
    %c0_i32 = arith.constant 0 : i32
    %c0_i32_0 = arith.constant 0 : i32
    return %arg0, %c0_i32 : i32, i32
  }
}

</mosaic_0001>

<bundles_post_ra>
// kernel: neuromodulated_agent_forward.1
= control target key start
LH: loop header
LB: loop body
LE: loop exit
PB: predicated region body
PF: predicated region fallthrough
CT: control target
= control target key end

     0   :  { %15 = vsyncpa [#allocation3], 0  ;;  %s494_s13 = smov [#allocation2]   ;;  %s604_s0 = inlined_call_operand.vmem [shape: bf16[16,32], index: 0, kind: input, shape index: {}]   ;;  %s605_s1 = inlined_call_operand.vmem [shape: bf16[16,32], index: 1, kind: input, shape index: {}]   ;;  %s606_s2 = inlined_call_operand.vmem [shape: bf16[32,32], index: 2, kind: input, shape index: {}]   ;;  %s607_s3 = inlined_call_operand.vmem [shape: f32[1,32], index: 3, kind: input, shape index: {}]   ;;  %s608_s4 = inlined_call_operand.vmem [shape: bf16[32,32], index: 4, kind: input, shape index: {}]   ;;  %s609_s5 = inlined_call_operand.vmem [shape: f32[1,32], index: 5, kind: input, shape index: {}]   ;;  %s610_s6 = inlined_call_operand.vmem [shape: bf16[32,32], index: 6, kind: input, shape index: {}]   ;;  %s611_s7 = inlined_call_operand.vmem [shape: f32[1,32], index: 7, kind: input, shape index: {}]   ;;  %s612_s8 = inlined_call_operand.hbm [shape: bf16[32,128], index: 8, kind: input, shape index: {}]   ;;  %s613_s9 = inlined_call_operand.vmem [shape: f32[1,128], index: 9, kind: input, shape index: {}]   ;;  %s614_s10 = inlined_call_operand.vmem [shape: bf16[16,128], index: 10, kind: output, shape index: {}]  }
   0x1   :  { %s37_s14 = sshll.u32 %s494_s13, 4  ;;  %s38_s14 = int_to_ptr.vmem [resolvable:$true] %s37_s14 }
   0x2   :  { %s480_s15 = scalar_lea.vmem %s38_s14, 256  ;;  %p485_p1 = scmp.lt.s32.totalorder %s38_s14, %s38_s14 }
   0x3   :  { %p481_p0 = scmp.ne.s32.totalorder %s38_s14, %s480_s15  ;;  %p486_p2 = scmp.lt.s32.totalorder %s480_s15, %s480_s15 }
   0x5   :  { %p487_p3 = por %p486_p2, %p485_p1 }
   0x7   :  { %p488_p4 = pnand %p487_p3, %p481_p0 }
   0x9   :  { %491 = shalt.err (!%p488_p4)
}
   0xa   :  { %s495_s16 = smov 64   ;;  %s496_s17 = smov 4  }
   0xb   :  { %43 = dma.hbm_to_vmem [thread:$0]  %s612_s8, 256, %s38_s14, [#allocation3], %s495_s16, %s495_s16, %s496_s17  }
   0xc   :  { %492 = dma.done.wait [#allocation3], 256  }
   0xd   :  { %493 = vsyncadd [#allocation3], 4294967040  ;;  %v497_v0 = vmov 0.0   ;;  %vm498_vm0 = vmmov 0   ;;  %v446_v1 = vld [vmem:[%s608_s4 + $0x8] sm:$0xff]   ;;  %v447_v2 = vld [vmem:[%s608_s4] sm:$0xff]  }
   0xe   :  { %417 = vmatprep.subr.bf16.mxu1 %v497_v0  ;;  %421 = vmatprep.mubr.msk.bf16.mxu1 %vm498_vm0, %v497_v0  ;;  %vm80_vm1 = vcmask 261120   ;;  %v448_v3 = vld [vmem:[%s605_s1] sm:$0xff]   ;;  %v449_v4 = vld [vmem:[%s606_s2 + $0x8] sm:$0xff]  }
   0xf   :  { %409 = vmatprep.subr.bf16.mxu0 %v497_v0  ;;  %413 = vmatprep.mubr.msk.bf16.mxu0 %vm498_vm0, %v497_v0  ;;  %v450_v5 = vld [vmem:[%s606_s2] sm:$0xff]   ;;  %v452_v7 = vld [vmem:[%s610_s6 + $0x8] sm:$0xff]  }
  0x10   :  { %418 = vmatpush3.bf16.msra.mxu1 %v446_v1  ;;  %410 = vmatpush3.bf16.msra.mxu0 %v449_v4  ;;  %v451_v6 = vld [vmem:[%s604_s0] sm:$0xff]   ;;  %v454_v23 = vld [vmem:[#allocation2 + $0x8] sm:$0xff]  }
  0x11   :  { %419 = vmatprep.subr.bf16.mxu1 %v497_v0  ;;  %411 = vmatprep.subr.bf16.mxu0 %v497_v0  ;;  %v453_v8 = vld [vmem:[%s610_s6] sm:$0xff]  }
  0x12   :  { %v373_v9 = vld [vmem:[%s609_s5] ss:$0 sm:$0xff] }
  0x13   :  { %v455_v24 = vld [vmem:[#allocation2] sm:$0xff]  }
  0x14   :  { %420 = vmatpush3.bf16.msra.mxu1 %v447_v2  ;;  %412 = vmatpush3.bf16.msra.mxu0 %v450_v5  ;;  %v378_v25 = vld [vmem:[%s611_s7] ss:$0 sm:$0xff] }
  0x15   :  { %433 = vmatprep.subr.bf16.mxu1 %v497_v0  ;;  %425 = vmatprep.subr.bf16.mxu0 %v497_v0  ;;  %v368_v34 = vld [vmem:[%s607_s3] ss:$0 sm:$0xff] }
  0x16   :  { %v384_v49 = vld [vmem:[%s613_s9] ss:$0 sm:$0xff] }
  0x17   :  { %422 = vmatmul.mubr.msk.bf16.vlgmr.msra.gmra.mxu1 %vm80_vm1, %v448_v3  ;;  %414 = vmatmul.mubr.msk.bf16.vlgmr.msra.gmra.mxu0 %vm80_vm1, %v451_v6 }
  0x18   :  { %437 = vmatprep.mubr.msk.bf16.mxu1 %vm498_vm0, %v497_v0  ;;  %426 = vmatpush3.bf16.msra.mxu0 %v452_v7 }
  0x19   :  { %429 = vmatprep.mubr.msk.bf16.mxu0 %vm498_vm0, %v497_v0  ;;  %427 = vmatprep.subr.bf16.mxu0 %v497_v0 }
  0x1a   :  { %434 = vmatpush3.bf16.msra.mxu1 %v454_v23 }
  0x1b   :  { %435 = vmatprep.subr.bf16.mxu1 %v497_v0 }
  0x1c   :  { %428 = vmatpush3.bf16.msra.mxu0 %v453_v8 }
  0x1e   :  { %436 = vmatpush3.bf16.msra.mxu1 %v455_v24 }
  0xd7   :  { %v194_v10 = vpop.f32.mrf.mxu1  ;;  %v118_v19 = vpop.f32.mrf.mxu0 }
  0xd8   :  { %v195_v11 = vadd.f32 %v373_v9, %v194_v10  ;;  %v119_v36 = vadd.f32 %v368_v34, %v118_v19 }
  0xd9   :  { %v423_v12 = vpop.f32.mrf.mxu1  ;;  %v415_v20 = vpop.f32.mrf.mxu0 }
  0xda   :  { %456 = vtanh.f32 %v195_v11 }
  0xdb   :  { %v197_v13 = vpop.f32.mrf.mxu1  ;;  %v121_v21 = vpop.f32.mrf.mxu0 }
  0xdc   :  { %v198_v14 = vadd.f32 %v373_v9, %v197_v13  ;;  %v122_v38 = vadd.f32 %v368_v34, %v121_v21 }
  0xdd   :  { %v424_v15 = vpop.f32.mrf.mxu1  ;;  %v416_v22 = vpop.f32.mrf.mxu0 }
  0xde   :  { %458 = vtanh.f32 %v198_v14 }
  0xe7   :  { %v457_v16 = vpop.eup %456 }
  0xeb   :  { %v459_v17 = vpop.eup %458 }
  0xec   :  { %v203_v18 = vpack.c.bf16 %v459_v17, %v457_v16 }
  0xee   :  { %430 = vmatmul.mubr.msk.bf16.vlgmr.msra.gmra.mxu0 %vm80_vm1, %v203_v18 }
 0x1ae   :  { %v264_v26 = vpop.f32.mrf.mxu0 }
 0x1af   :  { %v265_v27 = vadd.f32 %v378_v25, %v264_v26 }
 0x1b0   :  { %v431_v28 = vpop.f32.mrf.mxu0 }
 0x1b1   :  { %v382_v29 = vmul.f32 -1.442695, %v265_v27 }
 0x1b2   :  { %v267_v30 = vpop.f32.mrf.mxu0 }
 0x1b3   :  { %460 = vpow2.f32 %v382_v29  ;;  %v268_v31 = vadd.f32 %v378_v25, %v267_v30 }
 0x1b4   :  { %v432_v32 = vpop.f32.mrf.mxu0 }
 0x1b5   :  { %v383_v33 = vmul.f32 -1.442695, %v268_v31 }
 0x1b7   :  { %462 = vpow2.f32 %v383_v33 }
 0x1b8   :  { %464 = vtanh.f32 %v119_v36 }
 0x1c0   :  { %v461_v35 = vpop.eup %460 }
 0x1c1   :  { %v277_v37 = vadd.f32 1.0, %v461_v35 }
 0x1c3   :  { %466 = vrcp.f32 %v277_v37 }
 0x1c4   :  { %v463_v39 = vpop.eup %462  ;;  %468 = vtanh.f32 %v122_v38 }
 0x1c5   :  { %v278_v40 = vadd.f32 1.0, %v463_v39  ;;  %v465_v41 = vpop.eup %464 }
 0x1c7   :  { %470 = vrcp.f32 %v278_v40 }
 0x1d0   :  { %v467_v42 = vpop.eup %466 }
 0x1d1   :  { %v469_v43 = vpop.eup %468  ;;  %v283_v45 = vmul.f32 %v467_v42, %v465_v41 }
 0x1d4   :  { %v471_v44 = vpop.eup %470 }
 0x1d5   :  { %v284_v46 = vmul.f32 %v471_v44, %v469_v43 }
 0x1d7   :  { %v285_v47 = vpack.c.bf16 %v284_v46, %v283_v45 }
 0x1d9   :  { %438 = vmatmul.mubr.msk.bf16.vlgmr.msra.gmra.mxu1 %vm80_vm1, %v285_v47 }
 0x299   :  { %v346_v48 = vpop.f32.mrf.mxu1 }
 0x29a   :  { %v347_v52 = vadd.f32 %v384_v49, %v346_v48 }
 0x29b   :  { %v439_v50 = vpop.f32.mrf.mxu1 }
 0x29d   :  { %v349_v51 = vpop.f32.mrf.mxu1 }
 0x29e   :  { %v350_v53 = vadd.f32 %v384_v49, %v349_v51 }
 0x29f   :  { %v440_v54 = vpop.f32.mrf.mxu1 }
 0x2a0   :  { %v395_v55 = vpack.c.bf16 %v350_v53, %v347_v52 }
 0x2a2   :  { %396 = vst [vmem:[%s614_s10] sm:$0xff] %v395_v55  }
 0x2a3   :  { %367 = vsyncpa [#allocation3], 1 }

</bundles_post_ra>
